<compile_context>
chip_gen: v7x
topology: tpu7x:2x2x1
jax: 0.10.0
libtpu: 0.0.40
codegen_flags: <defaults>
</compile_context>

<pallas_src>
import jax
import jax.numpy as jnp
from jax.experimental import pallas as pl
from jax.experimental.pallas import tpu as pltpu

# ---- deterministic constants from HH_Fast.__init__ ----
GNA, GK, GL = 120.0, 36.0, 0.3
ENA, EK, EL = 55.0, -77.0, -65.0
VT, KP = -3.0, 8.0
INF_V12 = (-40.0, -53.0, -62.0)
INF_K = (15.0, 15.0, -7.0)
TAU_BASE = (0.04, 1.1, 1.2)
TAU_AMP = (0.46, 4.7, 7.4)
TAU_VMAX = (-38.0, -79.0, -67.0)
TAU_VAR = (30.0 ** 2, 50.0 ** 2, 20.0 ** 2)  # module squares tau_var in __init__

# Baked reciprocals (Python-float constant folding; replaces per-element divides).
HALF_INV_INF_K = tuple(0.5 / k for k in INF_K)
INV_TAU_VAR = tuple(1.0 / v for v in TAU_VAR)

_ROWS = 8  # sublane-dense row count for the flattened layout


def hh_kernel(iapp_ref, v_ref, k_ref, dv_ref, dk_ref):
    V = v_ref[...]                       # (R, TL) f32
    m = k_ref[0]                         # (R, TL) — loaded once, reused below
    n = k_ref[1]
    h = k_ref[2]
    gates = (m, n, h)
    iapp = iapp_ref[0]                   # scalar from SMEM

    # TODO(synk): self.T = sigmoid((V - Vt)/Kp) is a module-state side effect in
    # PyTorch (not part of the returned derivative); it is not emitted as an output.

    pow1 = GNA * (m * m * m) * h
    pow2 = GK * (n * n * n * n)
    # dVdt = Iapp - G*V + E  ==  Iapp + pow1*(Ena-V) + pow2*(Ek-V) + gl*(El-V)
    dv_ref[...] = iapp + pow1 * (ENA - V) + pow2 * (EK - V) + GL * (EL - V)

    # gating variables: dK/dt = (inf(V) - K) / tau(V), per-channel constants unrolled
    for c in range(3):
        # sigmoid(x) == 0.5*tanh(0.5*x) + 0.5 : one EUP op instead of exp + reciprocal
        inf_c = 0.5 * jnp.tanh((V - INF_V12[c]) * HALF_INV_INF_K[c]) + 0.5
        # -(Vmax - V)/var == (V - Vmax) * (1/var)
        tau_c = TAU_BASE[c] + TAU_AMP[c] * jnp.exp((V - TAU_VMAX[c]) * INV_TAU_VAR[c])
        dk_ref[c] = (inf_c - gates[c]) / tau_c


def _pick_tile(C, max_tl):
    """Largest lane count (multiple of 128, divisor of C) <= max_tl; prefer an even
    number of grid steps (keeps both v7x TensorCores busy) if that costs <= 2x steps."""
    nb = C // 128
    cands = [128 * d for d in range(1, nb + 1) if nb % d == 0 and 128 * d <= max_tl]
    best = max(cands)
    even = [t for t in cands if (C // t) % 2 == 0 and t * 2 >= best]
    return max(even) if even else best


def hh_forward(iapp, V, K, *, max_tl=16384):
    """iapp: (1,) f32, V: (B, L) f32, K: (3, B, L) f32 -> (dVdt, dKdt)."""
    B, L = V.shape
    assert K.shape == (3, B, L)
    N = B * L

    # ---- layout plumbing: flatten to a sublane/lane-dense (8, C) slab ----
    pad = (-N) % (_ROWS * 128)
    Vf = V.reshape(-1)
    Kf = K.reshape(3, -1)
    if pad:
        Vf = jnp.pad(Vf, (0, pad))
        Kf = jnp.pad(Kf, ((0, 0), (0, pad)))
    Np = N + pad
    C = Np // _ROWS                      # multiple of 128
    V2 = Vf.reshape(_ROWS, C)
    K2 = Kf.reshape(3, _ROWS, C)

    tl = _pick_tile(C, max_tl)
    grid = (C // tl,)

    dV2, dK2 = pl.pallas_call(
        hh_kernel,
        out_shape=(
            jax.ShapeDtypeStruct((_ROWS, C), jnp.float32),
            jax.ShapeDtypeStruct((3, _ROWS, C), jnp.float32),
        ),
        grid=grid,
        in_specs=[
            pl.BlockSpec(memory_space=pltpu.MemorySpace.SMEM),            # Iapp scalar
            pl.BlockSpec((_ROWS, tl), lambda i: (0, i)),                  # V tile
            pl.BlockSpec((3, _ROWS, tl), lambda i: (0, 0, i)),            # K tile
        ],
        out_specs=(
            pl.BlockSpec((_ROWS, tl), lambda i: (0, i)),
            pl.BlockSpec((3, _ROWS, tl), lambda i: (0, 0, i)),
        ),
        compiler_params=pltpu.CompilerParams(
            dimension_semantics=("parallel",),
            vmem_limit_bytes=32 * 1024 * 1024,
        ),
    )(iapp, V2, K2)

    dV = dV2.reshape(-1)[:N].reshape(B, L)
    dK = dK2.reshape(3, -1)[:, :N].reshape(3, B, L)
    return dV, dK


def hh_forward_ref(iapp, V, K):
    """Pure-JAX reference mirroring the PyTorch forward exactly."""
    m, n, h = K[0], K[1], K[2]
    pow1 = GNA * m ** 3 * h
    pow2 = GK * n ** 4
    G = pow1 + pow2 + GL
    E = pow1 * ENA + pow2 * EK + GL * EL
    dVdt = iapp[0] - G * V + E
    inf_v12 = jnp.array(INF_V12, jnp.float32).reshape(3, 1, 1)
    inf_k = jnp.array(INF_K, jnp.float32).reshape(3, 1, 1)
    tau_base = jnp.array(TAU_BASE, jnp.float32).reshape(3, 1, 1)
    tau_amp = jnp.array(TAU_AMP, jnp.float32).reshape(3, 1, 1)
    tau_vmax = jnp.array(TAU_VMAX, jnp.float32).reshape(3, 1, 1)
    tau_var = jnp.array(TAU_VAR, jnp.float32).reshape(3, 1, 1)
    inf = jax.nn.sigmoid((V[None] - inf_v12) / inf_k)
    tau = tau_base + tau_amp * jnp.exp(-(tau_vmax - V[None]) / tau_var)
    dKdt = (inf - K) / tau
    return dVdt, dKdt


def _check(B, L, key):
    kv, kk = jax.random.split(key)
    # Plausible HH-like state: membrane voltage around -65 mV, gates in [0, 1]
    V = (-65.0 + 10.0 * jax.random.normal(kv, (B, L))).astype(jnp.float32)
    K = jax.random.uniform(kk, (3, B, L), dtype=jnp.float32)
    iapp = jnp.zeros((1,), jnp.float32)  # nn.Parameter init: 0.0

    dV, dK = jax.block_until_ready(hh_forward(iapp, V, K))
    dV_ref, dK_ref = hh_forward_ref(iapp, V, K)

    assert dV.shape == (B, L) and dK.shape == (3, B, L)
    # dV uses an algebraically-refactored (but equivalent) formulation -> slightly
    # looser atol for cancellation cases; dK stays tight.
    assert jnp.allclose(dV, dV_ref, rtol=1e-5, atol=1e-2)
    assert jnp.allclose(dK, dK_ref, rtol=1e-5, atol=1e-4)


if __name__ == "__main__":
    key = jax.random.PRNGKey(0)
    k1, k2 = jax.random.split(key)
    _check(4, 256, k1)    # B*L = 1024: exact (8, 128) slab, single grid step
    _check(4, 2000, k2)   # B*L = 8000: exercises padding + multi-step grid
    print("KERNEL_OK")
</pallas_src>

<mosaic_0001>
module attributes {stable_mosaic.version = 11 : i64} {
  func.func @hh_kernel(%arg0: i32, %arg1: memref<1xf32, #tpu.memory_space<smem>>, %arg2: memref<8x128xf32, #tpu.memory_space<vmem>>, %arg3: memref<3x8x128xf32, #tpu.memory_space<vmem>>, %arg4: memref<8x128xf32, #tpu.memory_space<vmem>>, %arg5: memref<3x8x128xf32, #tpu.memory_space<vmem>>) attributes {dimension_semantics = [#tpu.dimension_semantics<parallel>], iteration_bounds = array<i64: 1>, scalar_prefetch = 0 : i64, scratch_operands = 0 : i64, tpu.core_type = #tpu.core_type<tc>, window_params = [{transform_indices = @transform_0, window_bounds = array<i64: 1>}, {transform_indices = @transform_1, window_bounds = array<i64: 8, 128>}, {transform_indices = @transform_2, window_bounds = array<i64: 3, 8, 128>}, {transform_indices = @transform_3, window_bounds = array<i64: 8, 128>}, {transform_indices = @transform_4, window_bounds = array<i64: 3, 8, 128>}]} {
    %c0 = arith.constant 0 : index
    %c0_0 = arith.constant 0 : index
    %0 = vector.load %arg2[%c0, %c0_0] : memref<8x128xf32, #tpu.memory_space<vmem>>, vector<8x128xf32>
    %c0_1 = arith.constant 0 : index
    %c0_2 = arith.constant 0 : index
    %c0_3 = arith.constant 0 : index
    %1 = vector.load %arg3[%c0_1, %c0_2, %c0_3] : memref<3x8x128xf32, #tpu.memory_space<vmem>>, vector<1x8x128xf32>
    %2 = vector.shape_cast %1 : vector<1x8x128xf32> to vector<8x128xf32>
    %c1 = arith.constant 1 : index
    %c0_4 = arith.constant 0 : index
    %c0_5 = arith.constant 0 : index
    %3 = vector.load %arg3[%c1, %c0_4, %c0_5] : memref<3x8x128xf32, #tpu.memory_space<vmem>>, vector<1x8x128xf32>
    %4 = vector.shape_cast %3 : vector<1x8x128xf32> to vector<8x128xf32>
    %c2 = arith.constant 2 : index
    %c0_6 = arith.constant 0 : index
    %c0_7 = arith.constant 0 : index
    %5 = vector.load %arg3[%c2, %c0_6, %c0_7] : memref<3x8x128xf32, #tpu.memory_space<vmem>>, vector<1x8x128xf32>
    %6 = vector.shape_cast %5 : vector<1x8x128xf32> to vector<8x128xf32>
    %c0_8 = arith.constant 0 : index
    %7 = memref.load %arg1[%c0_8] : memref<1xf32, #tpu.memory_space<smem>>
    %8 = arith.mulf %2, %2 : vector<8x128xf32>
    %9 = arith.mulf %8, %2 : vector<8x128xf32>
    %cst = arith.constant 1.200000e+02 : f32
    %10 = vector.broadcast %cst : f32 to vector<8x128xf32>
    %11 = arith.mulf %10, %9 : vector<8x128xf32>
    %12 = arith.mulf %11, %6 : vector<8x128xf32>
    %13 = arith.mulf %4, %4 : vector<8x128xf32>
    %14 = arith.mulf %13, %4 : vector<8x128xf32>
    %15 = arith.mulf %14, %4 : vector<8x128xf32>
    %cst_9 = arith.constant 3.600000e+01 : f32
    %16 = vector.broadcast %cst_9 : f32 to vector<8x128xf32>
    %17 = arith.mulf %16, %15 : vector<8x128xf32>
    %cst_10 = arith.constant 5.500000e+01 : f32
    %18 = vector.broadcast %cst_10 : f32 to vector<8x128xf32>
    %19 = arith.subf %18, %0 : vector<8x128xf32>
    %20 = arith.mulf %12, %19 : vector<8x128xf32>
    %21 = vector.broadcast %7 : f32 to vector<8x128xf32>
    %22 = arith.addf %21, %20 : vector<8x128xf32>
    %cst_11 = arith.constant -7.700000e+01 : f32
    %23 = vector.broadcast %cst_11 : f32 to vector<8x128xf32>
    %24 = arith.subf %23, %0 : vector<8x128xf32>
    %25 = arith.mulf %17, %24 : vector<8x128xf32>
    %26 = arith.addf %22, %25 : vector<8x128xf32>
    %cst_12 = arith.constant -6.500000e+01 : f32
    %27 = vector.broadcast %cst_12 : f32 to vector<8x128xf32>
    %28 = arith.subf %27, %0 : vector<8x128xf32>
    %cst_13 = arith.constant 3.000000e-01 : f32
    %29 = vector.broadcast %cst_13 : f32 to vector<8x128xf32>
    %30 = arith.mulf %29, %28 : vector<8x128xf32>
    %31 = arith.addf %26, %30 : vector<8x128xf32>
    %c0_14 = arith.constant 0 : index
    %c0_15 = arith.constant 0 : index
    %32 = vector.load %arg4[%c0_14, %c0_15] : memref<8x128xf32, #tpu.memory_space<vmem>>, vector<8x128xf32>
    tpu.vector_store %arg4[%c0_14, %c0_15], %31 {strides = array<i32>} : memref<8x128xf32, #tpu.memory_space<vmem>>, vector<8x128xf32>,
    %cst_16 = arith.constant -4.000000e+01 : f32
    %33 = vector.broadcast %cst_16 : f32 to vector<8x128xf32>
    %34 = arith.subf %0, %33 : vector<8x128xf32>
    %cst_17 = arith.constant 0.0333333351 : f32
    %35 = vector.broadcast %cst_17 : f32 to vector<8x128xf32>
    %36 = arith.mulf %34, %35 : vector<8x128xf32>
    %37 = math.tanh %36 : vector<8x128xf32>
    %cst_18 = arith.constant 5.000000e-01 : f32
    %38 = vector.broadcast %cst_18 : f32 to vector<8x128xf32>
    %39 = arith.mulf %38, %37 : vector<8x128xf32>
    %cst_19 = arith.constant 5.000000e-01 : f32
    %40 = vector.broadcast %cst_19 : f32 to vector<8x128xf32>
    %41 = arith.addf %39, %40 : vector<8x128xf32>
    %cst_20 = arith.constant -3.800000e+01 : f32
    %42 = vector.broadcast %cst_20 : f32 to vector<8x128xf32>
    %43 = arith.subf %0, %42 : vector<8x128xf32>
    %cst_21 = arith.constant 0.00111111114 : f32
    %44 = vector.broadcast %cst_21 : f32 to vector<8x128xf32>
    %45 = arith.mulf %43, %44 : vector<8x128xf32>
    %46 = math.exp %45 : vector<8x128xf32>
    %cst_22 = arith.constant 4.600000e-01 : f32
    %47 = vector.broadcast %cst_22 : f32 to vector<8x128xf32>
    %48 = arith.mulf %47, %46 : vector<8x128xf32>
    %cst_23 = arith.constant 4.000000e-02 : f32
    %49 = vector.broadcast %cst_23 : f32 to vector<8x128xf32>
    %50 = arith.addf %49, %48 : vector<8x128xf32>
    %51 = arith.subf %41, %2 : vector<8x128xf32>
    %52 = arith.divf %51, %50 : vector<8x128xf32>
    %c0_24 = arith.constant 0 : index
    %c0_25 = arith.constant 0 : index
    %c0_26 = arith.constant 0 : index
    %53 = vector.load %arg5[%c0_24, %c0_25, %c0_26] : memref<3x8x128xf32, #tpu.memory_space<vmem>>, vector<1x8x128xf32>
    %54 = vector.shape_cast %53 : vector<1x8x128xf32> to vector<8x128xf32>
    %55 = vector.shape_cast %52 : vector<8x128xf32> to vector<1x8x128xf32>
    tpu.vector_store %arg5[%c0_24, %c0_25, %c0_26], %55 {strides = array<i32>} : memref<3x8x128xf32, #tpu.memory_space<vmem>>, vector<1x8x128xf32>,
    %cst_27 = arith.constant -5.300000e+01 : f32
    %56 = vector.broadcast %cst_27 : f32 to vector<8x128xf32>
    %57 = arith.subf %0, %56 : vector<8x128xf32>
    %cst_28 = arith.constant 0.0333333351 : f32
    %58 = vector.broadcast %cst_28 : f32 to vector<8x128xf32>
    %59 = arith.mulf %57, %58 : vector<8x128xf32>
    %60 = math.tanh %59 : vector<8x128xf32>
    %cst_29 = arith.constant 5.000000e-01 : f32
    %61 = vector.broadcast %cst_29 : f32 to vector<8x128xf32>
    %62 = arith.mulf %61, %60 : vector<8x128xf32>
    %cst_30 = arith.constant 5.000000e-01 : f32
    %63 = vector.broadcast %cst_30 : f32 to vector<8x128xf32>
    %64 = arith.addf %62, %63 : vector<8x128xf32>
    %cst_31 = arith.constant -7.900000e+01 : f32
    %65 = vector.broadcast %cst_31 : f32 to vector<8x128xf32>
    %66 = arith.subf %0, %65 : vector<8x128xf32>
    %cst_32 = arith.constant 4.000000e-04 : f32
    %67 = vector.broadcast %cst_32 : f32 to vector<8x128xf32>
    %68 = arith.mulf %66, %67 : vector<8x128xf32>
    %69 = math.exp %68 : vector<8x128xf32>
    %cst_33 = arith.constant 4.700000e+00 : f32
    %70 = vector.broadcast %cst_33 : f32 to vector<8x128xf32>
    %71 = arith.mulf %70, %69 : vector<8x128xf32>
    %cst_34 = arith.constant 1.100000e+00 : f32
    %72 = vector.broadcast %cst_34 : f32 to vector<8x128xf32>
    %73 = arith.addf %72, %71 : vector<8x128xf32>
    %74 = arith.subf %64, %4 : vector<8x128xf32>
    %75 = arith.divf %74, %73 : vector<8x128xf32>
    %c1_35 = arith.constant 1 : index
    %c0_36 = arith.constant 0 : index
    %c0_37 = arith.constant 0 : index
    %76 = vector.load %arg5[%c1_35, %c0_36, %c0_37] : memref<3x8x128xf32, #tpu.memory_space<vmem>>, vector<1x8x128xf32>
    %77 = vector.shape_cast %76 : vector<1x8x128xf32> to vector<8x128xf32>
    %78 = vector.shape_cast %75 : vector<8x128xf32> to vector<1x8x128xf32>
    tpu.vector_store %arg5[%c1_35, %c0_36, %c0_37], %78 {strides = array<i32>} : memref<3x8x128xf32, #tpu.memory_space<vmem>>, vector<1x8x128xf32>,
    %cst_38 = arith.constant -6.200000e+01 : f32
    %79 = vector.broadcast %cst_38 : f32 to vector<8x128xf32>
    %80 = arith.subf %0, %79 : vector<8x128xf32>
    %cst_39 = arith.constant -0.0714285746 : f32
    %81 = vector.broadcast %cst_39 : f32 to vector<8x128xf32>
    %82 = arith.mulf %80, %81 : vector<8x128xf32>
    %83 = math.tanh %82 : vector<8x128xf32>
    %cst_40 = arith.constant 5.000000e-01 : f32
    %84 = vector.broadcast %cst_40 : f32 to vector<8x128xf32>
    %85 = arith.mulf %84, %83 : vector<8x128xf32>
    %cst_41 = arith.constant 5.000000e-01 : f32
    %86 = vector.broadcast %cst_41 : f32 to vector<8x128xf32>
    %87 = arith.addf %85, %86 : vector<8x128xf32>
    %cst_42 = arith.constant -6.700000e+01 : f32
    %88 = vector.broadcast %cst_42 : f32 to vector<8x128xf32>
    %89 = arith.subf %0, %88 : vector<8x128xf32>
    %cst_43 = arith.constant 2.500000e-03 : f32
    %90 = vector.broadcast %cst_43 : f32 to vector<8x128xf32>
    %91 = arith.mulf %89, %90 : vector<8x128xf32>
    %92 = math.exp %91 : vector<8x128xf32>
    %cst_44 = arith.constant 7.400000e+00 : f32
    %93 = vector.broadcast %cst_44 : f32 to vector<8x128xf32>
    %94 = arith.mulf %93, %92 : vector<8x128xf32>
    %cst_45 = arith.constant 1.200000e+00 : f32
    %95 = vector.broadcast %cst_45 : f32 to vector<8x128xf32>
    %96 = arith.addf %95, %94 : vector<8x128xf32>
    %97 = arith.subf %87, %6 : vector<8x128xf32>
    %98 = arith.divf %97, %96 : vector<8x128xf32>
    %c2_46 = arith.constant 2 : index
    %c0_47 = arith.constant 0 : index
    %c0_48 = arith.constant 0 : index
    %99 = vector.load %arg5[%c2_46, %c0_47, %c0_48] : memref<3x8x128xf32, #tpu.memory_space<vmem>>, vector<1x8x128xf32>
    %100 = vector.shape_cast %99 : vector<1x8x128xf32> to vector<8x128xf32>
    %101 = vector.shape_cast %98 : vector<8x128xf32> to vector<1x8x128xf32>
    tpu.vector_store %arg5[%c2_46, %c0_47, %c0_48], %101 {strides = array<i32>} : memref<3x8x128xf32, #tpu.memory_space<vmem>>, vector<1x8x128xf32>,
    return
  }
  func.func @transform_0(%arg0: i32) -> i32 {
    %c0_i32 = arith.constant 0 : i32
    %c0_i32_0 = arith.constant 0 : i32
    return %c0_i32 : i32
  }
  func.func @transform_1(%arg0: i32) -> (i32, i32) {
    %c0_i32 = arith.constant 0 : i32
    %c0_i32_0 = arith.constant 0 : i32
    return %c0_i32, %arg0 : i32, i32
  }
  func.func @transform_2(%arg0: i32) -> (i32, i32, i32) {
    %c0_i32 = arith.constant 0 : i32
    %c0_i32_0 = arith.constant 0 : i32
    %c0_i32_1 = arith.constant 0 : i32
    return %c0_i32, %c0_i32_0, %arg0 : i32, i32, i32
  }
  func.func @transform_3(%arg0: i32) -> (i32, i32) {
    %c0_i32 = arith.constant 0 : i32
    %c0_i32_0 = arith.constant 0 : i32
    return %c0_i32, %arg0 : i32, i32
  }
  func.func @transform_4(%arg0: i32) -> (i32, i32, i32) {
    %c0_i32 = arith.constant 0 : i32
    %c0_i32_0 = arith.constant 0 : i32
    %c0_i32_1 = arith.constant 0 : i32
    return %c0_i32, %c0_i32_0, %arg0 : i32, i32, i32
  }
}

</mosaic_0001>

<bundles_post_ra>
// kernel: tpu_custom_call.1
= control target key start
LH: loop header
LB: loop body
LE: loop exit
PB: predicated region body
PF: predicated region fallthrough
CT: control target
= control target key end

     0   :  { %11 = vsyncpa [#allocation4], 0  ;;  %s388_s0 = inlined_call_operand.<no memory space> [shape: f32[1], index: 0, kind: input, shape index: {}]   ;;  %s389_s1 = inlined_call_operand.hbm [shape: f32[8,128], index: 1, kind: input, shape index: {}]   ;;  %s390_s2 = inlined_call_operand.hbm [shape: f32[3,8,128], index: 2, kind: input, shape index: {}]   ;;  %s391_s3 = inlined_call_operand.hbm [shape: f32[8,128], index: 3, kind: output, shape index: {0}]   ;;  %s392_s4 = inlined_call_operand.hbm [shape: f32[3,8,128], index: 4, kind: output, shape index: {1}]  }
   0x1   :  { %12 = vsyncpa [#allocation7], 0 }
   0x2   :  { %13 = vsyncpa [#allocation5], 0 }
   0x3   :  { %14 = vsyncpa [#allocation10], 0  ;;  %s276_s15 = smov [#allocation3]   ;;  %s277_s17 = smov [#allocation6]  }
   0x4   :  { %s23_s16 = sshll.u32 %s276_s15, 4  ;;  %s32_s18 = sshll.u32 %s277_s17, 4  ;;  %s24_s16 = int_to_ptr.vmem [resolvable:$true] %s23_s16  ;;  %s307_s18 = int_to_ptr.vmem [resolvable:$true] %s32_s18 }
   0x5   :  { %s180_s21 = scalar_lea.hbm %s389_s1, 128 }
   0x6   :  { %p181_p0 = scmp.ne.s32.totalorder %s389_s1, %s180_s21  ;;  %p184_p1 = scmp.lt.u32.totalorder %s180_s21, %s389_s1 }
   0x8   :  { %p186_p2 = pnand %p184_p1, %p181_p0 }
   0xa   :  { %189 = shalt.err (!%p186_p2)
}
   0xb   :  { %s190_s26 = scalar_lea.vmem %s24_s16, 128  ;;  %p195_p4 = scmp.lt.s32.totalorder %s24_s16, %s24_s16 }
   0xc   :  { %p191_p3 = scmp.ne.s32.totalorder %s24_s16, %s190_s26  ;;  %p196_p5 = scmp.lt.s32.totalorder %s190_s26, %s190_s26 }
   0xe   :  { %p197_p6 = por %p196_p5, %p195_p4 }
  0x10   :  { %p198_p7 = pnand %p197_p6, %p191_p3 }
  0x12   :  { %201 = shalt.err (!%p198_p7)
}
  0x13   :  { %26 = dma.hbm_to_vmem [thread:$0]  %s389_s1, 128, %s24_s16, [#allocation4]  }
  0x14   :  { %s202_s5 = scalar_lea.hbm %s390_s2, 384 }
  0x15   :  { %p203_p8 = scmp.ne.s32.totalorder %s390_s2, %s202_s5  ;;  %p206_p9 = scmp.lt.u32.totalorder %s202_s5, %s390_s2 }
  0x17   :  { %p208_p10 = pnand %p206_p9, %p203_p8 }
  0x19   :  { %211 = shalt.err (!%p208_p10)
}
  0x1a   :  { %s212_s10 = scalar_lea.vmem %s307_s18, 384  ;;  %p217_p12 = scmp.lt.s32.totalorder %s307_s18, %s307_s18 }
  0x1b   :  { %p213_p11 = scmp.ne.s32.totalorder %s307_s18, %s212_s10  ;;  %p218_p13 = scmp.lt.s32.totalorder %s212_s10, %s212_s10 }
  0x1d   :  { %p219_p0 = por %p218_p13, %p217_p12 }
  0x1f   :  { %p220_p1 = pnand %p219_p0, %p213_p11 }
  0x21   :  { %223 = shalt.err (!%p220_p1)
}
  0x22   :  { %s278_s1 = smov 128   ;;  %s279_s11 = smov 8  }
  0x23   :  { %38 = dma.hbm_to_vmem [thread:$0]  %s390_s2, 384, %s307_s18, [#allocation7], %s278_s1, %s278_s1, %s279_s11  }
  0x24   :  { %268 = dma.done.wait [#allocation4], 128  }
  0x25   :  { %269 = vsyncadd [#allocation4], 4294967168 }
  0x26   :  { %270 = dma.done.wait [#allocation7], 384  }
  0x27   :  { %271 = vsyncadd [#allocation7], 4294966912  ;;  %v45_v0 = vld [vmem:[#allocation3] sm:$0xff]  ;;  %v341_v1 = vld [vmem:[#allocation6] sm:$0xff]  ;;  %v62_v27 = vstv %s388_s0  ;;  %s280_s15 = smov [#allocation8]  }
  0x28   :  { %v343_v2 = vld [vmem:[#allocation6 + $0x8] sm:$0xff]  ;;  %v52_v3 = vmul.f32 %v341_v1, %v341_v1  ;;  %v150_v5 = vadd.f32 40.0, %v45_v0  ;;  %v151_v6 = vadd.f32 38.0, %v45_v0  ;;  %v152_v7 = vadd.f32 53.0, %v45_v0  ;;  %v349_v8 = vld [vmem:[#allocation6 + $0x10] sm:$0xff]  ;;  %s124_s16 = sshll.u32 %s280_s15, 4  ;;  %s125_s16 = int_to_ptr.vmem [resolvable:$true] %s124_s16 }
  0x29   :  { %v56_v4 = vmul.f32 %v343_v2, %v343_v2  ;;  %v153_v11 = vadd.f32 79.0, %v45_v0  ;;  %v60_v12 = vsub.f32 55.0, %v45_v0  ;;  %v64_v13 = vsub.f32 -77.0, %v45_v0  ;;  %s224_s0 = scalar_lea.vmem %s125_s16, 128  ;;  %p229_p3 = scmp.lt.s32.totalorder %s125_s16, %s125_s16 }
  0x2a   :  { %v53_v9 = vmul.f32 %v52_v3, %v341_v1  ;;  %v72_v14 = vmul.f32 0.033333335, %v150_v5  ;;  %v77_v15 = vmul.f32 0.0011111111, %v151_v6  ;;  %v154_v19 = vadd.f32 62.0, %v45_v0  ;;  %p225_p2 = scmp.ne.s32.totalorder %s125_s16, %s224_s0  ;;  %p230_p4 = scmp.lt.s32.totalorder %s224_s0, %s224_s0 }
  0x2b   :  { %v57_v10 = vmul.f32 %v56_v4, %v343_v2  ;;  %v92_v18 = vmul.f32 0.0004, %v153_v11  ;;  %v67_v20 = vsub.f32 -65.0, %v45_v0  ;;  %v87_v22 = vmul.f32 0.033333335, %v152_v7 }
  0x2c   :  { %v54_v16 = vmul.f32 120.0, %v53_v9  ;;  %v78_v21 = vmul.f32 1.442695, %v77_v15  ;;  %v155_v23 = vadd.f32 67.0, %v45_v0  ;;  %162 = vtanh.f32 %v72_v14  ;;  %p231_p5 = por %p230_p4, %p229_p3 }
  0x2d   :  { %v58_v17 = vmul.f32 %v57_v10, %v343_v2  ;;  %v93_v26 = vmul.f32 1.442695, %v92_v18  ;;  %v103_v31 = vmul.f32 -0.071428575, %v154_v19  ;;  %v68_v34 = vmul.f32 0.3, %v67_v20 }
  0x2e   :  { %v55_v24 = vmul.f32 %v54_v16, %v349_v8  ;;  %164 = vpow2.f32 %v78_v21  ;;  %v108_v28 = vmul.f32 0.0025, %v155_v23  ;;  %p232_p6 = pnand %p231_p5, %p225_p2 }
  0x2f   :  { %v59_v25 = vmul.f32 36.0, %v58_v17  ;;  %166 = vpow2.f32 %v93_v26 }
  0x30   :  { %v61_v29 = vmul.f32 %v60_v12, %v55_v24  ;;  %168 = vtanh.f32 %v87_v22  ;;  %v109_v32 = vmul.f32 1.442695, %v108_v28 }
  0x31   :  { %v65_v30 = vmul.f32 %v64_v13, %v59_v25 }
  0x32   :  { %v63_v33 = vadd.f32 %v62_v27, %v61_v29  ;;  %170 = vpow2.f32 %v109_v32 }
  0x33   :  { %172 = vtanh.f32 %v103_v31 }
  0x34   :  { %v66_v35 = vadd.f32 %v65_v30, %v63_v33 }
  0x36   :  { %v69_v36 = vadd.f32 %v68_v34, %v66_v35  ;;  %v163_v37 = vpop.eup %162 }
  0x38   :  { %70 = vst [vmem:[#allocation8] sm:$0xff] %v69_v36  ;;  %v165_v38 = vpop.eup %164 }
  0x39   :  { %235 = shalt.err (!%p232_p6)
}
  0x3a   :  { %s236_s19 = scalar_lea.hbm %s391_s3, 128 }
  0x3b   :  { %p237_p7 = scmp.ne.s32.totalorder %s391_s3, %s236_s19  ;;  %p240_p8 = scmp.lt.u32.totalorder %s236_s19, %s391_s3 }
  0x3d   :  { %p242_p9 = pnand %p240_p8, %p237_p7 }
  0x3f   :  { %245 = shalt.err (!%p242_p9)
}
  0x40   :  { %127 = dma.vmem_to_hbm [thread:$0]  %s125_s16, 128, %s391_s3, [#allocation5]   ;;  %v167_v39 = vpop.eup %166  ;;  %v80_v40 = vmul.f32 0.46, %v165_v38  ;;  %v74_v45 = vmul.f32 0.5, %v163_v37 }
  0x41   :  { %v169_v41 = vpop.eup %168  ;;  %v95_v42 = vmul.f32 4.7, %v167_v39  ;;  %s281_s3 = smov [#allocation9]  }
  0x42   :  { %v81_v43 = vadd.f32 0.04, %v80_v40  ;;  %v171_v44 = vpop.eup %170  ;;  %v89_v48 = vmul.f32 0.5, %v169_v41  ;;  %v75_v51 = vadd.f32 0.5, %v74_v45  ;;  %s133_s26 = sshll.u32 %s281_s3, 4  ;;  %s134_s26 = int_to_ptr.vmem [resolvable:$true] %s133_s26 }
  0x43   :  { %v96_v46 = vadd.f32 1.1, %v95_v42  ;;  %v173_v47 = vpop.eup %172  ;;  %v111_v49 = vmul.f32 7.4, %v171_v44  ;;  %s246_s27 = scalar_lea.vmem %s134_s26, 384  ;;  %p251_p11 = scmp.lt.s32.totalorder %s134_s26, %s134_s26 }
  0x44   :  { %174 = vrcp.f32 %v81_v43  ;;  %v105_v52 = vmul.f32 0.5, %v173_v47  ;;  %v90_v53 = vadd.f32 0.5, %v89_v48  ;;  %v82_v54 = vsub.f32 %v75_v51, %v341_v1  ;;  %p247_p10 = scmp.ne.s32.totalorder %s134_s26, %s246_s27  ;;  %p252_p12 = scmp.lt.s32.totalorder %s246_s27, %s246_s27 }
  0x45   :  { %176 = vrcp.f32 %v96_v46  ;;  %v112_v50 = vadd.f32 1.2, %v111_v49 }
  0x46   :  { %v106_v55 = vadd.f32 0.5, %v105_v52  ;;  %v97_v56 = vsub.f32 %v90_v53, %v343_v2  ;;  %p253_p13 = por %p252_p12, %p251_p11 }
  0x47   :  { %178 = vrcp.f32 %v112_v50 }
  0x48   :  { %v113_v60 = vsub.f32 %v106_v55, %v349_v8  ;;  %p254_p0 = pnand %p253_p13, %p247_p10 }
  0x4e   :  { %v175_v57 = vpop.eup %174 }
  0x4f   :  { %v177_v58 = vpop.eup %176  ;;  %v84_v59 = vmul.f32 %v175_v57, %v82_v54 }
  0x50   :  { %v99_v61 = vmul.f32 %v177_v58, %v97_v56 }
  0x51   :  { %85 = vst [vmem:[#allocation9] sm:$0xff] %v84_v59  ;;  %v179_v62 = vpop.eup %178 }
  0x52   :  { %101 = vst [vmem:[#allocation9 + $0x8] sm:$0xff] %v99_v61  ;;  %v115_v63 = vmul.f32 %v179_v62, %v113_v60 }
  0x54   :  { %117 = vst [vmem:[#allocation9 + $0x10] sm:$0xff] %v115_v63 }
  0x55   :  { %257 = shalt.err (!%p254_p0)
}
  0x56   :  { %s258_s30 = scalar_lea.hbm %s392_s4, 384 }
  0x57   :  { %p259_p1 = scmp.ne.s32.totalorder %s392_s4, %s258_s30  ;;  %p262_p2 = scmp.lt.u32.totalorder %s258_s30, %s392_s4 }
  0x59   :  { %p264_p3 = pnand %p262_p2, %p259_p1 }
  0x5b   :  { %267 = shalt.err (!%p264_p3)
}
  0x5c   :  { %139 = dma.vmem_to_hbm [thread:$0]  %s134_s26, 384, %s392_s4, [#allocation10], %s278_s1, %s278_s1, %s279_s11  }
  0x5d   :  { %272 = dma.done.wait [#allocation5], 128  }
  0x5e   :  { %273 = vsyncadd [#allocation5], 4294967168 }
  0x5f   :  { %274 = dma.done.wait [#allocation10], 384  }
  0x60   :  { %275 = vsyncadd [#allocation10], 4294966912 }
  0x61   :  { %146 = vsyncpa [#allocation4], 1 }
  0x62   :  { %147 = vsyncpa [#allocation7], 1 }
  0x63   :  { %148 = vsyncpa [#allocation5], 1 }
  0x64   :  { %149 = vsyncpa [#allocation10], 1 }

</bundles_post_ra>
